<compile_context>
chip_gen: v5e
topology: v5e:2x2
jax: 0.10.0
libtpu: 0.0.40
codegen_flags: <defaults>
</compile_context>

<pallas_src>
import functools

import jax
import jax.numpy as jnp
from jax.experimental import pallas as pl
from jax.experimental.pallas import tpu as pltpu

LN_EPS = 1e-12


def _round_up(x, m):
    return ((x + m - 1) // m) * m


def _feature_resizer_kernel(x_ref, w_ref, p_ref, o_ref, *, compute_dtype):
    # x_ref: (TM, C1)  input dtype (cast in-kernel to compute_dtype)
    # w_ref: (C1, C2)  transposed weight, resident across grid steps
    # p_ref: (3,  C2)  f32 rows: [bias; gamma; beta]
    # o_ref: (TM, C2)
    x = x_ref[...].astype(compute_dtype)

    # Linear on the MXU, f32 accumulation, + bias.
    y = jnp.dot(x, w_ref[...], preferred_element_type=jnp.float32)
    p = p_ref[...]
    y = y + p[0:1, :]

    # LayerNorm over the feature axis (two-pass variance in f32).
    mean = jnp.mean(y, axis=-1, keepdims=True)
    d = y - mean
    var = jnp.mean(d * d, axis=-1, keepdims=True)
    y_norm = d * jax.lax.rsqrt(var + LN_EPS)
    y_norm = y_norm * p[1:2, :] + p[2:3, :]

    # Dropout: identity in eval/inference mode.
    # TODO(synk): training-mode dropout (p=0.1) via pltpu.prng_seed + pltpu.stateful_bernoulli.
    o_ref[...] = y_norm.astype(o_ref.dtype)


def prepare_feature_resizer_params(weight, bias, gamma, beta, *, param_dtype=jnp.bfloat16):
    """One-time parameter prep (do at load time, NOT per forward call).

    weight: [C2, C1], bias/gamma/beta: [C2].
    bf16 params are strongly recommended (especially on v5e): ~2x MXU rate and
    half the weight traffic vs f32.
    """
    c2, c1 = weight.shape
    w_t = jnp.asarray(weight, param_dtype).T                     # (C1, C2)
    pvec = jnp.stack([jnp.asarray(bias, jnp.float32),
                      jnp.asarray(gamma, jnp.float32),
                      jnp.asarray(beta, jnp.float32)], axis=0)   # (3, C2)
    return {"w_t": w_t, "p": pvec, "c1": c1, "c2": c2}


def feature_resizer_apply(encoder_features, params, *, tm=1024):
    """encoder_features: [B, S, C1]; params from prepare_feature_resizer_params."""
    B, S, C1 = encoder_features.shape
    assert C1 == params["c1"], "input feature size mismatch"
    C2 = params["c2"]
    w_t = params["w_t"]
    pvec = params["p"]

    N = B * S
    out_dtype = encoder_features.dtype
    compute_dtype = w_t.dtype

    bytes_x = jnp.dtype(encoder_features.dtype).itemsize
    bytes_o = jnp.dtype(out_dtype).itemsize
    bytes_w = jnp.dtype(w_t.dtype).itemsize

    # Generation-aware budgets (v5e/v6e: 128 MiB VMEM; v7x: 64 MiB per TC).
    try:
        vmem_cap = int(getattr(pltpu.get_tpu_info(), "vmem_capacity_bytes", 128 << 20))
    except Exception:  # pragma: no cover - conservative fallback
        vmem_cap = 128 << 20
    if vmem_cap >= (96 << 20):
        tile_budget = 36 << 20      # v5e / v6e: keep TM large (~85% HBM roofline regime)
        vmem_limit_cap = 48 << 20
    else:
        tile_budget = 22 << 20      # v7x: tighter plan under 64 MiB/TC
        vmem_limit_cap = 40 << 20

    # Token-tile size. block dim == full dim is always legal; otherwise multiple of 8.
    TM = min(int(tm), N)
    if N >= 256:
        # Ensure >= 2 grid steps so v7x's two TensorCores both get work.
        TM = min(TM, max(128, _round_up(pl.cdiv(N, 2), 8)))
    if TM < N:
        TM = _round_up(TM, 8)
    # Per-row pipelined bytes: double-buffered x + out tiles plus f32 LN intermediates.
    per_row = 2 * C1 * bytes_x + 2 * C2 * bytes_o + 4 * _round_up(C2, 128) * 4
    while TM > 128 and TM < N and TM * per_row > tile_budget:
        TM = max(128, ((TM // 2) // 8) * 8)

    grid = (pl.cdiv(N, TM),)

    # No pad, no astype: x goes straight to the kernel (ragged last block handled
    # by Pallas store-side masking; LN never reduces across rows).
    x2d = encoder_features.reshape(N, C1)

    c2_lanes = _round_up(C2, 128)
    est = (2 * TM * C1 * bytes_x            # double-buffered x tiles
           + 2 * TM * C2 * bytes_o          # double-buffered out tiles
           + 2 * C1 * C2 * bytes_w          # resident W (conservative: 2 buffers)
           + 2 * 8 * c2_lanes * 4           # fused bias/gamma/beta rows
           + 4 * TM * c2_lanes * 4)         # f32 y / LN intermediates (compiler scratch)
    vmem_limit = int(min(max(est + (8 << 20), 24 << 20), vmem_limit_cap))

    cost = pl.CostEstimate(
        flops=2 * N * C1 * C2,
        transcendentals=N,  # one rsqrt per token row
        bytes_accessed=N * C1 * bytes_x + N * C2 * bytes_o + C1 * C2 * bytes_w + 3 * C2 * 4,
    )

    out_flat = pl.pallas_call(
        functools.partial(_feature_resizer_kernel, compute_dtype=compute_dtype),
        out_shape=jax.ShapeDtypeStruct((N, C2), out_dtype),
        grid_spec=pltpu.PrefetchScalarGridSpec(
            num_scalar_prefetch=0,
            grid=grid,
            in_specs=[
                pl.BlockSpec((TM, C1), lambda i: (i, 0)),   # x tiles (pipelined)
                pl.BlockSpec((C1, C2), lambda i: (0, 0)),   # W^T resident in VMEM
                pl.BlockSpec((3, C2), lambda i: (0, 0)),    # fused bias/gamma/beta
            ],
            out_specs=pl.BlockSpec((TM, C2), lambda i: (i, 0)),
        ),
        compiler_params=pltpu.CompilerParams(
            dimension_semantics=("parallel",),   # v7x: shard token tiles over 2 TCs
            vmem_limit_bytes=vmem_limit,
        ),
        cost_estimate=cost,
    )(x2d, w_t, pvec)

    # (N, C2) -> (B, S, C2): contiguous metadata-only reshape, no extra HBM pass.
    return out_flat.reshape(B, S, C2)


def feature_resizer(encoder_features, weight, bias, gamma, beta, *,
                    param_dtype=jnp.bfloat16, tm=1024):
    """Convenience wrapper (prep + apply). For repeated calls, prepare params once."""
    params = prepare_feature_resizer_params(weight, bias, gamma, beta, param_dtype=param_dtype)
    return feature_resizer_apply(encoder_features, params, tm=tm)


if __name__ == "__main__":
    def ref_forward(x, weight, bias, gamma, beta):
        y = x @ weight.T + bias
        mean = y.mean(axis=-1, keepdims=True)
        var = ((y - mean) ** 2).mean(axis=-1, keepdims=True)
        return (y - mean) / jnp.sqrt(var + LN_EPS) * gamma + beta

    # Small shapes consistent with the module: batch=2, seq=8,
    # input_feat_size=32, output_feat_size=64.
    B, S, C1, C2 = 2, 8, 32, 64

    key = jax.random.PRNGKey(0)
    kx, kw, kb = jax.random.split(key, 3)

    x = jax.random.normal(kx, (B, S, C1), dtype=jnp.float32)

    # Deterministic parameter init (shapes per nn.Linear / nn.LayerNorm):
    #   fc.weight: [C2, C1], fc.bias: [C2], ln.weight=1, ln.bias=0
    bound = 1.0 / (C1 ** 0.5)
    weight = jax.random.uniform(kw, (C2, C1), minval=-bound, maxval=bound, dtype=jnp.float32)
    bias = jax.random.uniform(kb, (C2,), minval=-bound, maxval=bound, dtype=jnp.float32)
    gamma = jnp.ones((C2,), dtype=jnp.float32)
    beta = jnp.zeros((C2,), dtype=jnp.float32)

    y_ref = ref_forward(x, weight, bias, gamma, beta)

    # (a) f32-parameter path — tight tolerance vs the pure-JAX reference.
    params_f32 = prepare_feature_resizer_params(weight, bias, gamma, beta,
                                                param_dtype=jnp.float32)
    out_f32 = feature_resizer_apply(x, params_f32)
    jax.block_until_ready(out_f32)
    assert out_f32.shape == (B, S, C2)
    assert jnp.allclose(out_f32, y_ref, atol=1e-4, rtol=1e-4)

    # (b) bf16-parameter path (recommended production config) — x stays f32 in HBM
    # and is cast inside the kernel; bf16 tolerance.
    params_bf16 = prepare_feature_resizer_params(weight, bias, gamma, beta,
                                                 param_dtype=jnp.bfloat16)
    out_bf16 = feature_resizer_apply(x, params_bf16)
    jax.block_until_ready(out_bf16)
    assert out_bf16.shape == (B, S, C2)
    assert jnp.allclose(out_bf16.astype(jnp.float32), y_ref, atol=1e-1, rtol=5e-2)

    # (c) ragged last row-block: N % TM != 0 (B=2, S=7 -> N=14, TM=8, grid=2).
    Sr = 7
    xr = jax.random.normal(jax.random.PRNGKey(1), (B, Sr, C1), dtype=jnp.float32)
    yr_ref = ref_forward(xr, weight, bias, gamma, beta)
    out_r = feature_resizer_apply(xr, params_f32, tm=8)
    jax.block_until_ready(out_r)
    assert out_r.shape == (B, Sr, C2)
    assert jnp.allclose(out_r, yr_ref, atol=1e-4, rtol=1e-4)

    print("KERNEL_OK")
</pallas_src>

<mosaic_0001>
module attributes {stable_mosaic.version = 11 : i64} {
  func.func @_feature_resizer_kernel(%arg0: i32, %arg1: memref<16x32xf32, #tpu.memory_space<vmem>>, %arg2: memref<32x64xf32, #tpu.memory_space<vmem>>, %arg3: memref<3x64xf32, #tpu.memory_space<vmem>>, %arg4: memref<16x64xf32, #tpu.memory_space<vmem>>) attributes {dimension_semantics = [#tpu.dimension_semantics<parallel>], iteration_bounds = array<i64: 1>, scalar_prefetch = 0 : i64, scratch_operands = 0 : i64, tpu.core_type = #tpu.core_type<tc>, window_params = [{transform_indices = @transform_0, window_bounds = array<i64: 16, 32>}, {pipeline_mode = #tpu.pipeline_mode<synchronous>, transform_indices = @transform_1, window_bounds = array<i64: 32, 64>}, {pipeline_mode = #tpu.pipeline_mode<synchronous>, transform_indices = @transform_2, window_bounds = array<i64: 3, 64>}, {transform_indices = @transform_3, window_bounds = array<i64: 16, 64>}]} {
    %c0 = arith.constant 0 : index
    %c0_0 = arith.constant 0 : index
    %0 = vector.load %arg1[%c0, %c0_0] : memref<16x32xf32, #tpu.memory_space<vmem>>, vector<16x32xf32>
    %c0_1 = arith.constant 0 : index
    %c0_2 = arith.constant 0 : index
    %1 = vector.load %arg2[%c0_1, %c0_2] : memref<32x64xf32, #tpu.memory_space<vmem>>, vector<32x64xf32>
    %cst = arith.constant dense<0.000000e+00> : vector<16x64xf32>
    %2 = tpu.matmul %0, %1, %cst {dimension_numbers = #tpu.dot_dimension_numbers<[1], [0], [0], [1], [0, 0, 1, 1], [], []>} : vector<16x32xf32>, vector<32x64xf32>, vector<16x64xf32> -> vector<16x64xf32>
    %c0_3 = arith.constant 0 : index
    %c0_4 = arith.constant 0 : index
    %3 = vector.load %arg3[%c0_3, %c0_4] : memref<3x64xf32, #tpu.memory_space<vmem>>, vector<3x64xf32>
    %4 = vector.extract_strided_slice %3 {offsets = [0, 0], sizes = [1, 64], strides = [1, 1]} : vector<3x64xf32> to vector<1x64xf32>
    %5 = vector.broadcast %4 : vector<1x64xf32> to vector<16x64xf32>
    %6 = arith.addf %2, %5 : vector<16x64xf32>
    %cst_5 = arith.constant dense<0.000000e+00> : vector<16xf32>
    %7 = vector.multi_reduction <add>, %6, %cst_5 [1] : vector<16x64xf32> to vector<16xf32>
    %8 = vector.shape_cast %7 : vector<16xf32> to vector<16x1xf32>
    %cst_6 = arith.constant 6.400000e+01 : f32
    %9 = vector.broadcast %cst_6 : f32 to vector<16x1xf32>
    %10 = arith.divf %8, %9 : vector<16x1xf32>
    %11 = vector.broadcast %10 : vector<16x1xf32> to vector<16x64xf32>
    %12 = arith.subf %6, %11 : vector<16x64xf32>
    %13 = arith.mulf %12, %12 : vector<16x64xf32>
    %cst_7 = arith.constant dense<0.000000e+00> : vector<16xf32>
    %14 = vector.multi_reduction <add>, %13, %cst_7 [1] : vector<16x64xf32> to vector<16xf32>
    %15 = vector.shape_cast %14 : vector<16xf32> to vector<16x1xf32>
    %cst_8 = arith.constant 6.400000e+01 : f32
    %16 = vector.broadcast %cst_8 : f32 to vector<16x1xf32>
    %17 = arith.divf %15, %16 : vector<16x1xf32>
    %cst_9 = arith.constant 9.99999996E-13 : f32
    %18 = vector.broadcast %cst_9 : f32 to vector<16x1xf32>
    %19 = arith.addf %17, %18 : vector<16x1xf32>
    %20 = math.rsqrt %19 : vector<16x1xf32>
    %21 = vector.broadcast %20 : vector<16x1xf32> to vector<16x64xf32>
    %22 = arith.mulf %12, %21 : vector<16x64xf32>
    %23 = vector.extract_strided_slice %3 {offsets = [1, 0], sizes = [1, 64], strides = [1, 1]} : vector<3x64xf32> to vector<1x64xf32>
    %24 = vector.broadcast %23 : vector<1x64xf32> to vector<16x64xf32>
    %25 = arith.mulf %22, %24 : vector<16x64xf32>
    %26 = vector.extract_strided_slice %3 {offsets = [2, 0], sizes = [1, 64], strides = [1, 1]} : vector<3x64xf32> to vector<1x64xf32>
    %27 = vector.broadcast %26 : vector<1x64xf32> to vector<16x64xf32>
    %28 = arith.addf %25, %27 : vector<16x64xf32>
    %c0_10 = arith.constant 0 : index
    %c0_11 = arith.constant 0 : index
    %29 = vector.load %arg4[%c0_10, %c0_11] : memref<16x64xf32, #tpu.memory_space<vmem>>, vector<16x64xf32>
    tpu.vector_store %arg4[%c0_10, %c0_11], %28 {strides = array<i32>} : memref<16x64xf32, #tpu.memory_space<vmem>>, vector<16x64xf32>,
    return
  }
  func.func @transform_0(%arg0: i32) -> (i32, i32) {
    %c0_i32 = arith.constant 0 : i32
    %c0_i32_0 = arith.constant 0 : i32
    return %arg0, %c0_i32 : i32, i32
  }
  func.func @transform_1(%arg0: i32) -> (i32, i32) {
    %c0_i32 = arith.constant 0 : i32
    %c0_i32_0 = arith.constant 0 : i32
    %c0_i32_1 = arith.constant 0 : i32
    return %c0_i32, %c0_i32_0 : i32, i32
  }
  func.func @transform_2(%arg0: i32) -> (i32, i32) {
    %c0_i32 = arith.constant 0 : i32
    %c0_i32_0 = arith.constant 0 : i32
    %c0_i32_1 = arith.constant 0 : i32
    return %c0_i32, %c0_i32_0 : i32, i32
  }
  func.func @transform_3(%arg0: i32) -> (i32, i32) {
    %c0_i32 = arith.constant 0 : i32
    %c0_i32_0 = arith.constant 0 : i32
    return %arg0, %c0_i32 : i32, i32
  }
}

</mosaic_0001>

<bundles_post_ra>
// kernel: tpu_custom_call.1
= control target key start
LH: loop header
LB: loop body
LE: loop exit
PB: predicated region body
PF: predicated region fallthrough
CT: control target
= control target key end

     0   :  { %8 = vsyncpa [#allocation3], 0  ;;  %s358_s0 = inlined_call_operand.hbm [shape: f32[16,32], index: 0, kind: input, shape index: {}]   ;;  %s359_s1 = inlined_call_operand.hbm [shape: f32[32,64], index: 1, kind: input, shape index: {}]   ;;  %s360_s2 = inlined_call_operand.hbm [shape: f32[3,64], index: 2, kind: input, shape index: {}]   ;;  %s361_s3 = inlined_call_operand.hbm [shape: f32[16,64], index: 3, kind: output, shape index: {}]  }
   0x1   :  { %9 = vsyncpa [#allocation6], 0 }
   0x2   :  { %10 = vsyncpa [#allocation4], 0  ;;  %s28_s14 = sshll.u32 %s359_s1, 4  ;;  %s299_s15 = smov [#allocation5]   ;;  %s29_s14 = int_to_ptr.hbm [resolvable:$true] %s28_s14 }
   0x3   :  { %s30_s16 = sshll.u32 %s299_s15, 4  ;;  %s15_s19 = sshll.u32 %s358_s0, 4  ;;  %s31_s16 = int_to_ptr.vmem [resolvable:$true] %s30_s16  ;;  %s16_s19 = int_to_ptr.hbm [resolvable:$true] %s15_s19 }
   0x4   :  { %s300_s20 = smov 128   ;;  %s301_s21 = smov 8  }
   0x5   :  { %36 = dma.hbm_to_vmem [thread:$0]  %s29_s14, 512, %s31_s16, [#allocation6], %s300_s20, %s300_s20, %s301_s21  }
   0x6   :  { %s302_s22 = smov [#allocation2]   ;;  %s42_s1 = sshll.u32 %s360_s2, 4  ;;  %s43_s1 = int_to_ptr.hbm [resolvable:$true] %s42_s1 }
   0x7   :  { %s17_s23 = sshll.u32 %s302_s22, 4  ;;  %s303_s0 = smov [#allocation7]   ;;  %s18_s23 = int_to_ptr.vmem [resolvable:$true] %s17_s23 }
   0x8   :  { %23 = dma.hbm_to_vmem [thread:$0]  %s16_s19, 256, %s18_s23, [#allocation3], %s300_s20, %s300_s20, %s301_s21  }
   0x9   :  { %s44_s26 = sshll.u32 %s303_s0, 4  ;;  %s45_s26 = int_to_ptr.vmem [resolvable:$true] %s44_s26 }
   0xa   :  { %47 = dma.hbm_to_vmem [thread:$0]  %s43_s1, 64, %s45_s26, [#allocation6]  }
   0xb   :  { %293 = dma.done.wait [#allocation3], 256  }
   0xc   :  { %294 = vsyncadd [#allocation3], 4294967040 }
   0xd   :  { %295 = dma.done.wait [#allocation6], 576  }
   0xe   :  { %296 = vsyncadd [#allocation6], 4294966720  ;;  %v65_v0 = vld [vmem:[#allocation5 + $0x18] sm:$0xff]  ;;  %v64_v1 = vld [vmem:[#allocation5 + $0x10] sm:$0xff]  ;;  %vm68_vm0 = vcmask 261120   ;;  %vm98_vm1 = vcmask 523264  }
   0xf   :  { %87 = vmatpush.msra.mxu0 %v65_v0  ;;  %180 = vmatpush.msra.mxu1 %v65_v0  ;;  %v63_v2 = vld [vmem:[#allocation5 + $0x8] sm:$0xff]  ;;  %v62_v3 = vld [vmem:[#allocation5] sm:$0xff]  ;;  %v60_v4 = vld [vmem:[#allocation2] sm:$0xff]  ;;  %v304_v14 = vmov 64.0   ;;  %s305_s2 = smov [#allocation8]   ;;  %s164_s30 = sshll.u32 %s361_s3, 4  ;;  %s165_s30 = int_to_ptr.hbm [resolvable:$true] %s164_s30 }
  0x10   :  { %v61_v5 = vld [vmem:[#allocation2 + $0x8] sm:$0xff]  ;;  %v341_v6 = vld [vmem:[#allocation7] sm:$0x7]  ;;  %191 = vrcp.f32 %v304_v14  ;;  %s162_s27 = sshll.u32 %s305_s2, 4  ;;  %s163_s27 = int_to_ptr.vmem [resolvable:$true] %s162_s27 }
  0x11   :  { %88 = vmatpush.msra.mxu0 %v64_v1  ;;  %181 = vmatpush.msra.mxu1 %v64_v1  ;;  %v67_v7 = vperm.slane %v341_v6, 0  ;;  %v150_v45 = vperm.slane %v341_v6, 1  ;;  %v153_v48 = vperm.slane %v341_v6, 2 }
  0x13   :  { %89 = vmatpush.msra.mxu0 %v63_v2  ;;  %182 = vmatpush.msra.mxu1 %v63_v2 }
  0x15   :  { %90 = vmatpush.msra.mxu0 %v62_v3  ;;  %183 = vmatpush.msra.mxu1 %v62_v3 }
  0x16   :  { %178 = vmatmul.msk.f32.vlgmr.msra.gmra.mxu0 %vm68_vm0, %v60_v4  ;;  %179 = vmatmul.msk.f32.vlgmr.msra.gmra.mxu1 %vm68_vm0, %v61_v5  ;;  %v192_v15 = vpop.eup %191 }
  0x17   :  { %v106_v16 = vmul.f32 64.0, %v192_v15  ;;  %vm110_vm2 = vweird.f32 %v192_v15 }
  0x19   :  { %v107_v17 = vsub.f32 1.0, %v106_v16 }
  0x1b   :  { %v108_v18 = vmul.f32 %v192_v15, %v107_v17 }
  0x1d   :  { %v109_v19 = vadd.f32 %v192_v15, %v108_v18 }
  0x1f   :  { %v111_v20 = vsel %vm110_vm2, %v192_v15, %v109_v19 }
  0x93   :  { %v92_v8 = vpop.f32.mrf.mxu0  ;;  %v95_v10 = vpop.f32.mrf.mxu1 }
  0x94   :  { %v93_v9 = vadd.f32 %v92_v8, %v67_v7  ;;  %v96_v12 = vadd.f32 %v95_v10, %v67_v7 }
  0x96   :  { %v99_v11 = vsel %vm98_vm1, %v93_v9, 0.0  ;;  %v102_v13 = vsel %vm98_vm1, %v96_v12, 0.0 }
  0x97   :  { %100 = vadd.xlane.f32.xlu0 %v99_v11 }
  0x9f   :  { %103 = vadd.xlane.f32.xlu0 %v102_v13 }
 0x10a   :  { %v101_v21 = vpop.xlane.xlu0 %100 }
 0x10b   :  { %v112_v22 = vmul.f32 %v111_v20, %v101_v21 }
 0x10d   :  { %v114_v23 = vsub.f32 %v93_v9, %v112_v22 }
 0x10f   :  { %v116_v24 = vmul.f32 %v114_v23, %v114_v23 }
 0x111   :  { %v118_v25 = vsel %vm98_vm1, %v116_v24, 0.0 }
 0x112   :  { %119 = vadd.xlane.f32.xlu1 %v118_v25  ;;  %v104_v26 = vpop.xlane.xlu0 %103 }
 0x113   :  { %v113_v27 = vmul.f32 %v111_v20, %v104_v26 }
 0x115   :  { %v115_v28 = vsub.f32 %v96_v12, %v113_v27 }
 0x117   :  { %v117_v29 = vmul.f32 %v115_v28, %v115_v28 }
 0x119   :  { %v121_v30 = vsel %vm98_vm1, %v117_v29, 0.0 }
 0x11a   :  { %122 = vadd.xlane.f32.xlu1 %v121_v30 }
 0x185   :  { %v120_v31 = vpop.xlane.xlu1 %119 }
 0x186   :  { %v124_v32 = vmul.f32 %v120_v31, %v111_v20 }
 0x188   :  { %v126_v33 = vadd.f32 1e-12, %v124_v32 }
 0x18a   :  { %193 = vrsqrt.f32 %v126_v33  ;;  %vm134_vm4 = vweird.f32 %v126_v33 }
 0x18d   :  { %v123_v34 = vpop.xlane.xlu1 %122 }
 0x18e   :  { %v125_v35 = vmul.f32 %v123_v34, %v111_v20 }
 0x190   :  { %v194_v36 = vpop.eup %193  ;;  %v127_v37 = vadd.f32 1e-12, %v125_v35 }
 0x191   :  { %v129_v38 = vmul.f32 %v194_v36, %v126_v33  ;;  %vm135_vm3 = vweird.f32 %v194_v36 }
 0x192   :  { %195 = vrsqrt.f32 %v127_v37  ;;  %vm136_vm5 = vmor %vm134_vm4, %vm135_vm3  ;;  %vm144_vm7 = vweird.f32 %v127_v37 }
 0x193   :  { %v130_v39 = vmul.f32 %v194_v36, %v129_v38 }
 0x195   :  { %v131_v40 = vmul.f32 0.5, %v130_v39 }
 0x197   :  { %v132_v41 = vsub.f32 1.5, %v131_v40 }
 0x198   :  { %v196_v42 = vpop.eup %195 }
 0x199   :  { %v133_v43 = vmul.f32 %v194_v36, %v132_v41  ;;  %v139_v44 = vmul.f32 %v196_v42, %v127_v37  ;;  %vm145_vm6 = vweird.f32 %v196_v42 }
 0x19a   :  { %vm146_vm8 = vmor %vm144_vm7, %vm145_vm6 }
 0x19b   :  { %v137_v46 = vsel %vm136_vm5, %v194_v36, %v133_v43  ;;  %v140_v47 = vmul.f32 %v196_v42, %v139_v44 }
 0x19c   :  { %v148_v49 = vmul.f32 %v137_v46, %v114_v23 }
 0x19d   :  { %v141_v50 = vmul.f32 0.5, %v140_v47 }
 0x19e   :  { %v151_v51 = vmul.f32 %v150_v45, %v148_v49 }
 0x19f   :  { %v142_v52 = vsub.f32 1.5, %v141_v50 }
 0x1a0   :  { %v154_v53 = vadd.f32 %v153_v48, %v151_v51 }
 0x1a1   :  { %v143_v54 = vmul.f32 %v196_v42, %v142_v52 }
 0x1a2   :  { %156 = vst.msk [vmem:[#allocation8] sm:$0xff] %vm98_vm1, %v154_v53 }
 0x1a3   :  { %v147_v55 = vsel %vm146_vm8, %v196_v42, %v143_v54 }
 0x1a4   :  { %v149_v56 = vmul.f32 %v147_v55, %v115_v28 }
 0x1a6   :  { %v152_v57 = vmul.f32 %v150_v45, %v149_v56 }
 0x1a8   :  { %v155_v58 = vadd.f32 %v153_v48, %v152_v57 }
 0x1aa   :  { %157 = vst.msk [vmem:[#allocation8 + $0x8] sm:$0xff] %vm98_vm1, %v155_v58 }
 0x1ab   :  { %170 = dma.vmem_to_hbm [thread:$0]  %s163_s27, 256, %s165_s30, [#allocation4], %s300_s20, %s300_s20, %s301_s21  }
 0x1ac   :  { %297 = dma.done.wait [#allocation4], 256  }
 0x1ad   :  { %298 = vsyncadd [#allocation4], 4294967040 }
 0x1ae   :  { %175 = vsyncpa [#allocation3], 1 }
 0x1af   :  { %176 = vsyncpa [#allocation6], 1 }
 0x1b0   :  { %177 = vsyncpa [#allocation4], 1 }

</bundles_post_ra>
